<compile_context>
chip_gen: v7x
topology: tpu7x:2x2x1
jax: 0.10.0
libtpu: 0.0.40
codegen_flags: <defaults>
</compile_context>

<pallas_src>
import functools

import jax
import jax.numpy as jnp
from jax.experimental import pallas as pl
from jax.experimental.pallas import tpu as pltpu  # noqa: F401


def conv1x1_gelu_kernel(x_ref, w_ref, b_ref, o_ref):
    # v1 = W @ X + b : (C_out, C_in_p) @ (C_in_p, P) -> (C_out, P), NCHW-flattened.
    v1 = jnp.dot(w_ref[...], x_ref[...], preferred_element_type=jnp.float32)
    v1 = v1 + b_ref[...]                               # (C_out, 1) broadcast over lanes
    # tanh-GELU chain (algebraically identical to v2..v10 of the PyTorch graph)
    half = v1 * 0.5                                    # v2
    inner = v1 * (1.0 + 0.044715 * (v1 * v1))          # v6 = v1 + 0.044715*v1^3
    t = jnp.tanh(inner * 0.7978845608028654)           # v8
    o_ref[...] = (half * (t + 1.0)).astype(o_ref.dtype)  # v10


def _valid_window(size, out_size, stride, padding):
    """Valid (non-halo) sample range for a 1x1 conv with zero padding."""
    i_min = -(-padding // stride)                      # first out idx hitting real data
    i_max = min((size - 1 + padding) // stride, out_size - 1)
    n = i_max - i_min + 1
    src0 = stride * i_min - padding
    return src0, n, i_min, out_size - 1 - i_max        # src start, count, pad_lo, pad_hi


@functools.partial(jax.jit, static_argnames=("stride", "padding"))
def conv1x1_gelu(x_nchw, weight, bias, *, stride=2, padding=3):
    """x_nchw: (1, C_in, H, W); weight: (C_out, C_in, 1, 1); bias: (C_out,)"""
    N, C_in, H, W = x_nchw.shape
    C_out = weight.shape[0]
    assert N == 1, "kernel specialized for batch 1 (as in the reference module)"

    H_out = (H + 2 * padding - 1) // stride + 1
    W_out = (W + 2 * padding - 1) // stride + 1
    P = H_out * W_out                                  # 16 * 34 = 544

    # --- glue (2 HBM ops total): strided slice of valid positions, then one pad ---
    h0, nh, ph_lo, ph_hi = _valid_window(H, H_out, stride, padding)
    w0, nw, pw_lo, pw_hi = _valid_window(W, W_out, stride, padding)
    core = x_nchw[0, :, h0:h0 + stride * (nh - 1) + 1:stride,
                        w0:w0 + stride * (nw - 1) + 1:stride]       # (C_in, nh, nw)

    C_in_p = ((C_in + 7) // 8) * 8                     # 29 -> 32 (sublane-aligned K)
    x_mat = jnp.pad(core, ((0, C_in_p - C_in),
                           (ph_lo, ph_hi),
                           (pw_lo, pw_hi))).reshape(C_in_p, P)       # (32, 544)

    w_mat = jnp.pad(weight.reshape(C_out, C_in), ((0, 0), (0, C_in_p - C_in)))  # (98, 32)
    b_col = bias.reshape(C_out, 1)                                   # (98, 1)

    # --- single gridless block; output is already NCHW-flattened ---
    out = pl.pallas_call(
        conv1x1_gelu_kernel,
        out_shape=jax.ShapeDtypeStruct((C_out, P), jnp.float32),
        in_specs=[
            pl.BlockSpec((C_in_p, P), lambda: (0, 0)),
            pl.BlockSpec((C_out, C_in_p), lambda: (0, 0)),
            pl.BlockSpec((C_out, 1), lambda: (0, 0)),
        ],
        out_specs=pl.BlockSpec((C_out, P), lambda: (0, 0)),
    )(x_mat, w_mat, b_col)

    return out.reshape(1, C_out, H_out, W_out)         # free (contiguous reshape)


def _reference(x_nchw, weight, bias, *, stride=2, padding=3):
    # plain-JAX reference mirroring the PyTorch graph exactly
    v1 = jax.lax.conv_general_dilated(
        x_nchw, weight, window_strides=(stride, stride),
        padding=((padding, padding), (padding, padding)),
        dimension_numbers=("NCHW", "OIHW", "NCHW"),
    ) + bias[None, :, None, None]
    v2 = v1 * 0.5
    v6 = v1 + (v1 * v1 * v1) * 0.044715
    v8 = jnp.tanh(v6 * 0.7978845608028654)
    return v2 * (v8 + 1.0)


if __name__ == "__main__":
    key = jax.random.PRNGKey(0)
    k_x, k_w, k_b = jax.random.split(key, 3)

    C_in, C_out = 29, 98
    x = jax.random.normal(k_x, (1, C_in, 26, 62), dtype=jnp.float32)
    w = jax.random.normal(k_w, (C_out, C_in, 1, 1), dtype=jnp.float32) / jnp.sqrt(C_in)
    b = jax.random.normal(k_b, (C_out,), dtype=jnp.float32) * 0.1

    out = conv1x1_gelu(x, w, b)
    out = jax.block_until_ready(out)

    ref = _reference(x, w, b)
    assert out.shape == (1, 98, 16, 34), out.shape
    assert jnp.allclose(out, ref, atol=1e-4, rtol=1e-4), float(jnp.max(jnp.abs(out - ref)))

    print("KERNEL_OK")
</pallas_src>

<mosaic_0001>
module attributes {stable_mosaic.version = 11 : i64} {
  func.func @conv1x1_gelu_kernel(%arg0: memref<32x544xf32, #tpu.memory_space<vmem>>, %arg1: memref<98x32xf32, #tpu.memory_space<vmem>>, %arg2: memref<98x1xf32, #tpu.memory_space<vmem>>, %arg3: memref<98x544xf32, #tpu.memory_space<vmem>>) attributes {dimension_semantics = [], scalar_prefetch = 0 : i64, scratch_operands = 0 : i64, tpu.core_type = #tpu.core_type<tc>} {
    %c0 = arith.constant 0 : index
    %c0_0 = arith.constant 0 : index
    %0 = vector.load %arg1[%c0, %c0_0] : memref<98x32xf32, #tpu.memory_space<vmem>>, vector<98x32xf32>
    %c0_1 = arith.constant 0 : index
    %c0_2 = arith.constant 0 : index
    %1 = vector.load %arg0[%c0_1, %c0_2] : memref<32x544xf32, #tpu.memory_space<vmem>>, vector<32x544xf32>
    %cst = arith.constant dense<0.000000e+00> : vector<98x544xf32>
    %2 = tpu.matmul %0, %1, %cst {dimension_numbers = #tpu.dot_dimension_numbers<[1], [0], [0], [1], [0, 0, 1, 1], [], []>} : vector<98x32xf32>, vector<32x544xf32>, vector<98x544xf32> -> vector<98x544xf32>
    %c0_3 = arith.constant 0 : index
    %c0_4 = arith.constant 0 : index
    %3 = vector.load %arg2[%c0_3, %c0_4] : memref<98x1xf32, #tpu.memory_space<vmem>>, vector<98x1xf32>
    %4 = vector.broadcast %3 : vector<98x1xf32> to vector<98x544xf32>
    %5 = arith.addf %2, %4 : vector<98x544xf32>
    %cst_5 = arith.constant 5.000000e-01 : f32
    %6 = vector.broadcast %cst_5 : f32 to vector<98x544xf32>
    %7 = arith.mulf %5, %6 : vector<98x544xf32>
    %8 = arith.mulf %5, %5 : vector<98x544xf32>
    %cst_6 = arith.constant 4.471500e-02 : f32
    %9 = vector.broadcast %cst_6 : f32 to vector<98x544xf32>
    %10 = arith.mulf %9, %8 : vector<98x544xf32>
    %cst_7 = arith.constant 1.000000e+00 : f32
    %11 = vector.broadcast %cst_7 : f32 to vector<98x544xf32>
    %12 = arith.addf %11, %10 : vector<98x544xf32>
    %13 = arith.mulf %5, %12 : vector<98x544xf32>
    %cst_8 = arith.constant 0.797884583 : f32
    %14 = vector.broadcast %cst_8 : f32 to vector<98x544xf32>
    %15 = arith.mulf %13, %14 : vector<98x544xf32>
    %16 = math.tanh %15 : vector<98x544xf32>
    %cst_9 = arith.constant 1.000000e+00 : f32
    %17 = vector.broadcast %cst_9 : f32 to vector<98x544xf32>
    %18 = arith.addf %16, %17 : vector<98x544xf32>
    %19 = arith.mulf %7, %18 : vector<98x544xf32>
    %c0_10 = arith.constant 0 : index
    %c0_11 = arith.constant 0 : index
    %20 = vector.load %arg3[%c0_10, %c0_11] : memref<98x544xf32, #tpu.memory_space<vmem>>, vector<98x544xf32>
    tpu.vector_store %arg3[%c0_10, %c0_11], %19 {strides = array<i32>} : memref<98x544xf32, #tpu.memory_space<vmem>>, vector<98x544xf32>,
    return
  }
}

</mosaic_0001>

<bundles_post_ra>
// kernel: conv1x1_gelu.1
= control target key start
LH: loop header
LB: loop body
LE: loop exit
PB: predicated region body
PF: predicated region fallthrough
CT: control target
= control target key end

     0   :  { %v1501_v3 = vmov 0.0   ;;  %v1502_v8 = vmov 0   ;;  %vm125_vm0 = vcmask 261120   ;;  %v1503_v26 = vmov 0.0|0.0   ;;  %s2634_s0 = inlined_call_operand.vmem [shape: f32[32,544], index: 0, kind: input, shape index: {}]   ;;  %s2635_s1 = inlined_call_operand.vmem [shape: f32[98,32], index: 1, kind: input, shape index: {}]   ;;  %s2636_s2 = inlined_call_operand.vmem [shape: f32[98,1], index: 2, kind: input, shape index: {}]   ;;  %s2637_s3 = inlined_call_operand.vmem [shape: f32[98,544], index: 3, kind: output, shape index: {}]  }
   0x1   :  { %v28_v0 = vld [vmem:[%s2634_s0 + $0x8] sm:$0xff]  ;;  %v33_v1 = vld [vmem:[%s2634_s0 + $0x30] sm:$0xff]  ;;  %v27_v2 = vld [vmem:[%s2634_s0] sm:$0xff]  ;;  %229 = vmatprep.mubr.f32.mxu0 %v1501_v3  ;;  %271 = vmatprep.mubr.f32.mxu1 %v1501_v3  ;;  %vm1504_vm1 = vmmov 0   ;;  %vm1230_vm2 = vcmask 254976  }
   0x2   :  { %v1339_v4 = vpack.c.bf16 %v33_v1, %v28_v0  ;;  %v32_v5 = vld [vmem:[%s2634_s0 + $0x28] sm:$0xff]  ;;  %v38_v6 = vld [vmem:[%s2634_s0 + $0x58] sm:$0xff]  ;;  %v43_v7 = vld [vmem:[%s2634_s0 + $0x80] sm:$0xff]  ;;  %1370 = vset.pattern.permute.xlu1 %v1502_v8  ;;  %1369 = vset.pattern.permute.xlu0 %v1502_v8 }
   0x3   :  { %v1341_v9 = vpack.c.bf16 %v32_v5, %v27_v2  ;;  %v1343_v10 = vpack.c.bf16 %v43_v7, %v38_v6  ;;  %v37_v11 = vld [vmem:[%s2634_s0 + $0x50] sm:$0xff]  ;;  %v42_v12 = vld [vmem:[%s2634_s0 + $0x78] sm:$0xff]  ;;  %v35_v15 = vld [vmem:[%s2634_s0 + $0x40] sm:$0xff] }
   0x4   :  { %1340 = vmatprep.subr.bf16.mxu0 %v1339_v4  ;;  %1361 = vmatprep.subr.bf16.mxu1 %v1339_v4  ;;  %v1345_v13 = vpack.c.bf16 %v42_v12, %v37_v11  ;;  %v30_v14 = vld [vmem:[%s2634_s0 + $0x18] sm:$0xff]  ;;  %v31_v16 = vld [vmem:[%s2634_s0 + $0x20] sm:$0xff]  ;;  %v36_v17 = vld [vmem:[%s2634_s0 + $0x48] sm:$0xff] }
   0x5   :  { %1342 = vmatpush1.bf16.msra.mxu0 %v1341_v9  ;;  %1363 = vmatpush1.bf16.msra.mxu1 %v1341_v9  ;;  %v1347_v18 = vpack.c.bf16 %v35_v15, %v30_v14  ;;  %v29_v19 = vld [vmem:[%s2634_s0 + $0x10] sm:$0xff]  ;;  %v34_v20 = vld [vmem:[%s2634_s0 + $0x38] sm:$0xff]  ;;  %v40_v21 = vld [vmem:[%s2634_s0 + $0x68] sm:$0xff]  ;;  %v1356_v25 = vpack.c.bf16 %v36_v17, %v31_v16 }
   0x6   :  { %1344 = vmatprep.subr.bf16.mxu0 %v1343_v10  ;;  %1362 = vmatprep.subr.bf16.mxu1 %v1343_v10  ;;  %v45_v22 = vld [vmem:[%s2634_s0 + $0x90] sm:$0xff]  ;;  %v1578_v23 = vld [vmem:[%s2635_s1] sm:$0xff]  ;;  %v1583_v24 = vld [vmem:[%s2635_s1 + $0x38] sm:$0xff]  ;;  %v1349_v27 = vpack.c.bf16 %v34_v20, %v29_v19 }
   0x7   :  { %v41_v28 = vld [vmem:[%s2634_s0 + $0x70] sm:$0xff]  ;;  %v1351_v29 = vpack.c.bf16 %v45_v22, %v40_v21  ;;  %v46_v30 = vld [vmem:[%s2634_s0 + $0x98] sm:$0xff]  ;;  %v39_v31 = vld [vmem:[%s2634_s0 + $0x60] sm:$0xff] }
   0x8   :  { %v44_v32 = vld [vmem:[%s2634_s0 + $0x88] sm:$0xff]  ;;  %v1610_v34 = vld [vmem:[%s2635_s1 + $0x40] sm:$0xff]  ;;  %v1359_v35 = vpack.c.bf16 %v46_v30, %v41_v28  ;;  %v49_v37 = vld [vmem:[%s2636_s2 + $0x10] sm:$0xff] }
   0x9   :  { %1346 = vmatpush1.bf16.msra.mxu0 %v1345_v13  ;;  %1364 = vmatpush1.bf16.msra.mxu1 %v1345_v13  ;;  %v1605_v33 = vld [vmem:[%s2635_s1 + $0x8] sm:$0xff]  ;;  %v1353_v36 = vpack.c.bf16 %v44_v32, %v39_v31  ;;  %v47_v38 = vld [vmem:[%s2636_s2] sm:$0xff]  ;;  %v1628_v39 = vld [vmem:[%s2635_s1 + $0x10] sm:$0xff] }
   0xa   :  { %1355 = vmatprep.subr.bf16.mxu0 %v1503_v26  ;;  %1348 = vmatprep.subr.bf16.mxu1 %v1347_v18  ;;  %v1633_v40 = vld [vmem:[%s2635_s1 + $0x48] sm:$0xff]  ;;  %v50_v41 = vld [vmem:[%s2636_s2 + $0x18] sm:$0xff]  ;;  %v1653_v44 = vld [vmem:[%s2635_s1 + $0x50] sm:$0xff] }
   0xb   :  { %72 = vperm.xlu1 %1370, %v49_v37   ;;  %62 = vperm.xlu0 %1369, %v47_v38   ;;  %v48_v42 = vld [vmem:[%s2636_s2 + $0x8] sm:$0xff]  ;;  %v17_v43 = vld [vmem:[%s2635_s1 + $0x18] sm:$0xff]  ;;  %v51_v46 = vld [vmem:[%s2636_s2 + $0x20] sm:$0xff] }
   0xc   :  { %1236 = vmatmul.mubr.msk.f32.vlgmr.msra.gmra.mrb[0].mxu0 %vm125_vm0, %v1578_v23  ;;  %1243 = vmatmul.mubr.msk.f32.vlgmr.msra.gmra.mrb[0].mxu1 %vm125_vm0, %v1583_v24  ;;  %v52_v45 = vld [vmem:[%s2636_s2 + $0x28] sm:$0xff]  ;;  %v18_v47 = vld [vmem:[%s2635_s1 + $0x20] sm:$0xff]  ;;  %v1672_v48 = vld [vmem:[%s2635_s1 + $0x58] sm:$0xff] }
   0xd   :  { %1357 = vmatpush3.bf16.msra.mxu0 %v1356_v25  ;;  %235 = vmatprep.mubr.f32.mxu0 %v1501_v3  ;;  %v54_v49 = vld [vmem:[%s2636_s2 + $0x38] sm:$0xff]  ;;  %v53_v50 = vld [vmem:[%s2636_s2 + $0x30] sm:$0xff]  ;;  %v19_v51 = vld [vmem:[%s2635_s1 + $0x28] sm:$0xff] }
   0xe   :  { %277 = vmatprep.mubr.f32.mxu1 %v1501_v3  ;;  %1350 = vmatpush1.bf16.msra.mxu1 %v1349_v27  ;;  %v1691_v52 = vld [vmem:[%s2635_s1 + $0x60] sm:$0x3]  ;;  %v56_v54 = vld [vmem:[%s2636_s2 + $0x48] sm:$0xff]  ;;  %v20_v55 = vld [vmem:[%s2635_s1 + $0x30] sm:$0xff] }
   0xf   :  { %1358 = vmatprep.subr.bf16.mxu0 %v1503_v26  ;;  %1352 = vmatprep.subr.bf16.mxu1 %v1351_v29  ;;  %v55_v53 = vld [vmem:[%s2636_s2 + $0x40] sm:$0xff]  ;;  %v57_v56 = vld [vmem:[%s2636_s2 + $0x50] sm:$0xff]  ;;  %v58_v57 = vld [vmem:[%s2636_s2 + $0x58] sm:$0xff] }
  0x10   :  { %1237 = vmatmul.mubr.msk.f32.gmra.mrb[2].mxu0 %vm125_vm0, %v1605_v33  ;;  %1244 = vmatmul.mubr.msk.f32.gmra.mrb[2].mxu1 %vm125_vm0, %v1610_v34  ;;  %v59_v58 = vld [vmem:[%s2636_s2 + $0x60] sm:$0x3] }
  0x11   :  { %241 = vmatprep.mubr.f32.mxu0 %v1501_v3  ;;  %283 = vmatprep.mubr.f32.mxu1 %v1501_v3 }
  0x12   :  { %1360 = vmatpush3.bf16.msra.mxu0 %v1359_v35  ;;  %1354 = vmatpush1.bf16.msra.mxu1 %v1353_v36 }
  0x13   :  { %77 = vperm.xlu1 %1370, %v50_v41   ;;  %67 = vperm.xlu0 %1369, %v48_v42  }
  0x14   :  { %1238 = vmatmul.mubr.msk.f32.gmra.mrb[4].mxu0 %vm125_vm0, %v1628_v39  ;;  %1245 = vmatmul.mubr.msk.f32.gmra.mrb[4].mxu1 %vm125_vm0, %v1633_v40 }
  0x15   :  { %247 = vmatprep.mubr.f32.mxu0 %v1501_v3  ;;  %289 = vmatprep.mubr.f32.mxu1 %v1501_v3 }
  0x17   :  { %87 = vperm.xlu1 %1370, %v52_v45   ;;  %82 = vperm.xlu0 %1369, %v51_v46  }
  0x18   :  { %1239 = vmatmul.mubr.msk.f32.gmra.mrb[6].mxu0 %vm125_vm0, %v17_v43  ;;  %1246 = vmatmul.mubr.msk.f32.gmra.mrb[6].mxu1 %vm125_vm0, %v1653_v44 }
  0x19   :  { %253 = vmatprep.mubr.f32.mxu0 %v1501_v3  ;;  %295 = vmatprep.mubr.f32.mxu1 %v1501_v3 }
  0x1b   :  { %97 = vperm.xlu1 %1370, %v54_v49   ;;  %92 = vperm.xlu0 %1369, %v53_v50  }
  0x1c   :  { %1240 = vmatmul.mubr.msk.f32.gmra.mrb[8].mxu0 %vm125_vm0, %v18_v47  ;;  %1247 = vmatmul.mubr.msk.f32.gmra.mrb[8].mxu1 %vm125_vm0, %v1672_v48 }
  0x1d   :  { %259 = vmatprep.mubr.f32.mxu0 %v1501_v3  ;;  %301 = vmatprep.mubr.f32.mxu1 %v1501_v3 }
  0x1f   :  { %102 = vperm.xlu0 %1369, %v55_v53   ;;  %107 = vperm.xlu1 %1370, %v56_v54  }
  0x20   :  { %1241 = vmatmul.mubr.msk.f32.gmra.mrb[10].mxu0 %vm125_vm0, %v19_v51  ;;  %1248 = vmatmul.mubr.msk.f32.gmra.mrb[10].mxu1 %vm125_vm0, %v1691_v52 }
  0x21   :  { %265 = vmatprep.mubr.f32.mxu0 %v1501_v3  ;;  %372 = vmatprep.mubr.f32.mxu1 %v1501_v3 }
  0x23   :  { %112 = vperm.xlu0 %1369, %v57_v56   ;;  %117 = vperm.xlu1 %1370, %v58_v57  }
  0x24   :  { %1242 = vmatmul.mubr.msk.f32.gmra.mrb[12].mxu0 %vm125_vm0, %v20_v55  ;;  %1249 = vmatmul.mubr.msk.f32.vlgmr.msra.gmra.mrb[12].mxu1 %vm125_vm0, %v1578_v23 }
  0x25   :  { %378 = vmatprep.mubr.f32.mxu1 %v1501_v3  ;;  %1300 = vmatprep.mubr.msk.f32.mxu0 %vm1504_vm1, %v1501_v3 }
  0x27   :  { %122 = vperm.xlu0 %1369, %v59_v58  }
  0x28   :  { %1250 = vmatmul.mubr.msk.f32.gmra.mrb[14].mxu1 %vm125_vm0, %v1605_v33  ;;  %1301 = vmatmul.mubr.msk.f32.vlgmr.msra.gmra.mrb[14].mxu0 %vm125_vm0, %v1578_v23 }
  0x29   :  { %384 = vmatprep.mubr.f32.mxu1 %v1501_v3  ;;  %1303 = vmatprep.mubr.msk.f32.mxu0 %vm1504_vm1, %v1501_v3 }
  0x2c   :  { %1251 = vmatmul.mubr.msk.f32.gmra.mrb[16].mxu1 %vm125_vm0, %v1628_v39  ;;  %1304 = vmatmul.mubr.msk.f32.gmra.mrb[16].mxu0 %vm125_vm0, %v1605_v33 }
  0x2d   :  { %390 = vmatprep.mubr.f32.mxu1 %v1501_v3  ;;  %1306 = vmatprep.mubr.msk.f32.mxu0 %vm1504_vm1, %v1501_v3 }
  0x30   :  { %1252 = vmatmul.mubr.msk.f32.gmra.mrb[18].mxu1 %vm125_vm0, %v17_v43  ;;  %1307 = vmatmul.mubr.msk.f32.gmra.mrb[18].mxu0 %vm125_vm0, %v1628_v39 }
  0x31   :  { %396 = vmatprep.mubr.f32.mxu1 %v1501_v3  ;;  %1309 = vmatprep.mubr.msk.f32.mxu0 %vm1504_vm1, %v1501_v3 }
  0x34   :  { %1253 = vmatmul.mubr.msk.f32.gmra.mrb[20].mxu1 %vm125_vm0, %v18_v47  ;;  %1310 = vmatmul.mubr.msk.f32.gmra.mrb[20].mxu0 %vm125_vm0, %v17_v43 }
  0x35   :  { %402 = vmatprep.mubr.f32.mxu1 %v1501_v3  ;;  %1312 = vmatprep.mubr.msk.f32.mxu0 %vm1504_vm1, %v1501_v3 }
  0x38   :  { %1254 = vmatmul.mubr.msk.f32.gmra.mrb[22].mxu1 %vm125_vm0, %v19_v51  ;;  %1313 = vmatmul.mubr.msk.f32.gmra.mrb[22].mxu0 %vm125_vm0, %v18_v47 }
  0x39   :  { %408 = vmatprep.mubr.f32.mxu1 %v1501_v3  ;;  %1315 = vmatprep.mubr.msk.f32.mxu0 %vm1504_vm1, %v1501_v3 }
  0x3c   :  { %1255 = vmatmul.mubr.msk.f32.gmra.mrb[24].mxu1 %vm125_vm0, %v20_v55  ;;  %1316 = vmatmul.mubr.msk.f32.gmra.mrb[24].mxu0 %vm125_vm0, %v19_v51 }
  0x3d   :  { %414 = vmatprep.mubr.f32.mxu1 %v1501_v3  ;;  %1318 = vmatprep.mubr.msk.f32.mxu0 %vm1504_vm1, %v1501_v3 }
  0x40   :  { %1256 = vmatmul.mubr.msk.f32.gmra.mrb[26].mxu1 %vm125_vm0, %v1583_v24  ;;  %1319 = vmatmul.mubr.msk.f32.gmra.mrb[26].mxu0 %vm125_vm0, %v20_v55 }
  0x41   :  { %420 = vmatprep.mubr.f32.mxu1 %v1501_v3  ;;  %1321 = vmatprep.mubr.msk.f32.mxu0 %vm1504_vm1, %v1501_v3 }
  0x44   :  { %1257 = vmatmul.mubr.msk.f32.gmra.mrb[28].mxu1 %vm125_vm0, %v1610_v34  ;;  %1322 = vmatmul.mubr.msk.f32.gmra.mrb[28].mxu0 %vm125_vm0, %v1583_v24 }
  0x45   :  { %426 = vmatprep.mubr.f32.mxu1 %v1501_v3  ;;  %1324 = vmatprep.mubr.msk.f32.mxu0 %vm1504_vm1, %v1501_v3 }
  0x48   :  { %1258 = vmatmul.mubr.msk.f32.gmra.mrb[30].mxu1 %vm125_vm0, %v1633_v40  ;;  %1325 = vmatmul.mubr.msk.f32.gmra.mrb[30].mxu0 %vm125_vm0, %v1610_v34 }
  0x49   :  { %432 = vmatprep.mubr.f32.mxu1 %v1501_v3  ;;  %1327 = vmatprep.mubr.msk.f32.mxu0 %vm1504_vm1, %v1501_v3 }
  0x4c   :  { %1259 = vmatmul.mubr.msk.f32.gmra.mrb[32].mxu1 %vm125_vm0, %v1653_v44  ;;  %1328 = vmatmul.mubr.msk.f32.gmra.mrb[32].mxu0 %vm125_vm0, %v1633_v40 }
  0x4d   :  { %438 = vmatprep.mubr.f32.mxu1 %v1501_v3  ;;  %1330 = vmatprep.mubr.msk.f32.mxu0 %vm1504_vm1, %v1501_v3 }
  0x50   :  { %1260 = vmatmul.mubr.msk.f32.gmra.mrb[34].mxu1 %vm125_vm0, %v1672_v48  ;;  %1331 = vmatmul.mubr.msk.f32.gmra.mrb[34].mxu0 %vm125_vm0, %v1653_v44 }
  0x51   :  { %444 = vmatprep.mubr.f32.mxu1 %v1501_v3  ;;  %1333 = vmatprep.mubr.msk.f32.mxu0 %vm1504_vm1, %v1501_v3 }
  0x54   :  { %1261 = vmatmul.mubr.msk.f32.gmra.mrb[36].mxu1 %vm125_vm0, %v1691_v52  ;;  %1334 = vmatmul.mubr.msk.f32.gmra.mrb[36].mxu0 %vm125_vm0, %v1672_v48 }
  0x55   :  { %1336 = vmatprep.mubr.msk.f32.mxu0 %vm1504_vm1, %v1501_v3 }
  0x58   :  { %1337 = vmatmul.mubr.msk.f32.gmra.mrb[38].mxu0 %vm125_vm0, %v1691_v52 }
  0x8a   :  { %v1799_v59 = vpop.permute.xlu0 %62  ;;  %v1801_v60 = vpop.permute.xlu1 %72 }
  0x92   :  { %v1803_v61 = vpop.permute.xlu0 %67  ;;  %v1805_v62 = vpop.permute.xlu1 %77 }
  0x96   :  { %v1807_v63 = vpop.permute.xlu0 %82  ;;  %v1809_v0 = vpop.permute.xlu1 %87 }
  0x9a   :  { %v1811_v1 = vpop.permute.xlu0 %92  ;;  %v1813_v2 = vpop.permute.xlu1 %97 }
  0x9e   :  { %v1823_v11 = vpop.permute.xlu0 %102  ;;  %v1851_v49 = vpop.permute.xlu1 %107 }
  0x9f   :  { %2646 = vst [vmem:[#allocation2_spill] sm:$0xff] %v1851_v49 }
  0xdf   :  { %v231_v3 = vpop.f32.mrb[0].mxu0  ;;  %v273_v4 = vpop.f32.mrb[0].mxu1 }
  0xe0   :  { %v232_v5 = vadd.f32 %v231_v3, %v1799_v59  ;;  %v274_v6 = vadd.f32 %v273_v4, %v1813_v2  ;;  %v233_v7 = vpop.f32.mrb[1].mxu0  ;;  %v275_v8 = vpop.f32.mrb[1].mxu1 }
  0xe1   :  { %v1818_v9 = vadd.f32 %v233_v7, %v1799_v59  ;;  %v1821_v10 = vadd.f32 %v275_v8, %v1813_v2 }
  0xe2   :  { %v646_v12 = vmul.f32 %v232_v5, %v232_v5  ;;  %v681_v13 = vmul.f32 %v274_v6, %v274_v6  ;;  %v1849_v45 = vmul.f32 0.5, %v232_v5 }
  0xe3   :  { %v647_v14 = vmul.f32 %v1818_v9, %v1818_v9  ;;  %v682_v15 = vmul.f32 %v1821_v10, %v1821_v10  ;;  %v237_v16 = vpop.f32.mrb[2].mxu0  ;;  %v279_v17 = vpop.f32.mrb[2].mxu1 }
  0xe4   :  { %v711_v18 = vmul.f32 0.044715, %v646_v12  ;;  %v746_v19 = vmul.f32 0.044715, %v681_v13  ;;  %v1830_v20 = vadd.f32 %v237_v16, %v1803_v61  ;;  %v1833_v21 = vadd.f32 %v279_v17, %v1823_v11  ;;  %v239_v22 = vpop.f32.mrb[3].mxu0  ;;  %v281_v23 = vpop.f32.mrb[3].mxu1 }
  0xe5   :  { %v712_v24 = vmul.f32 0.044715, %v647_v14  ;;  %v747_v25 = vmul.f32 0.044715, %v682_v15  ;;  %v1836_v26 = vadd.f32 %v239_v22, %v1803_v61  ;;  %v1843_v33 = vadd.f32 %v281_v23, %v1823_v11 }
  0xe6   :  { %v776_v27 = vadd.f32 1.0, %v711_v18  ;;  %v811_v28 = vadd.f32 1.0, %v746_v19  ;;  %v651_v29 = vmul.f32 %v1830_v20, %v1830_v20  ;;  %v686_v32 = vmul.f32 %v1833_v21, %v1833_v21 }
  0xe7   :  { %v777_v30 = vadd.f32 1.0, %v712_v24  ;;  %v812_v31 = vadd.f32 1.0, %v747_v25  ;;  %v243_v34 = vpop.f32.mrb[4].mxu0  ;;  %v285_v35 = vpop.f32.mrb[4].mxu1  ;;  %v652_v44 = vmul.f32 %v1836_v26, %v1836_v26  ;;  %v687_v53 = vmul.f32 %v1843_v33, %v1843_v33 }
  0xe8   :  { %v841_v36 = vmul.f32 %v776_v27, %v232_v5  ;;  %v876_v37 = vmul.f32 %v811_v28, %v274_v6  ;;  %v716_v38 = vmul.f32 0.044715, %v651_v29  ;;  %v245_v39 = vpop.f32.mrb[5].mxu0  ;;  %v287_v40 = vpop.f32.mrb[5].mxu1  ;;  %v751_v43 = vmul.f32 0.044715, %v686_v32 }
  0xe9   :  { %v842_v41 = vmul.f32 %v777_v30, %v1818_v9  ;;  %v877_v42 = vmul.f32 %v812_v31, %v1821_v10  ;;  %v717_v56 = vmul.f32 0.044715, %v652_v44  ;;  %v1857_v57 = vadd.f32 %v243_v34, %v1801_v60  ;;  %v1890_v32 = vpop.permute.xlu0 %112 }
  0xea   :  { %v906_v46 = vmul.f32 0.7978846, %v841_v36  ;;  %v941_v47 = vmul.f32 0.7978846, %v876_v37  ;;  %v781_v48 = vadd.f32 1.0, %v716_v38  ;;  %v816_v52 = vadd.f32 1.0, %v751_v43 }
  0xeb   :  { %v907_v50 = vmul.f32 0.7978846, %v842_v41  ;;  %v942_v51 = vmul.f32 0.7978846, %v877_v42  ;;  %v249_v54 = vpop.f32.mrb[6].mxu0  ;;  %v291_v58 = vpop.f32.mrb[6].mxu1  ;;  %v1861_v7 = vadd.f32 %v285_v35, %v1851_v49  ;;  %v656_v17 = vmul.f32 %v1857_v57, %v1857_v57 }
  0xec   :  { %1371 = vtanh.f32 %v906_v46  ;;  %v846_v55 = vmul.f32 %v781_v48, %v1830_v20  ;;  %v251_v3 = vpop.f32.mrb[7].mxu0  ;;  %v881_v4 = vmul.f32 %v816_v52, %v1833_v21  ;;  %v752_v5 = vmul.f32 0.044715, %v687_v53  ;;  %v1863_v8 = vpop.f32.mrb[7].mxu1  ;;  %2647 = vst [vmem:[#allocation3_spill] sm:$0xff] %v1890_v32 }
  0xed   :  { %1373 = vtanh.f32 %v941_v47  ;;  %v1865_v12 = vmul.f32 0.5, %v274_v6  ;;  %v782_v14 = vadd.f32 1.0, %v717_v56  ;;  %v1874_v22 = vmul.f32 0.5, %v1818_v9 }
  0xee   :  { %1375 = vtanh.f32 %v907_v50  ;;  %v911_v13 = vmul.f32 0.7978846, %v846_v55  ;;  %v946_v15 = vmul.f32 0.7978846, %v881_v4  ;;  %v817_v16 = vadd.f32 1.0, %v752_v5 }
  0xef   :  { %1377 = vtanh.f32 %v942_v51  ;;  %v1869_v18 = vpop.f32.mrb[8].mxu0  ;;  %v1871_v19 = vpop.f32.mrb[8].mxu1  ;;  %v847_v6 = vmul.f32 %v782_v14, %v1836_v26  ;;  %v691_v23 = vmul.f32 %v1861_v7, %v1861_v7  ;;  %v721_v28 = vmul.f32 0.044715, %v656_v17 }
  0xf0   :  { %1379 = vtanh.f32 %v911_v13  ;;  %v1879_v24 = vpop.f32.mrb[9].mxu0  ;;  %v1881_v25 = vpop.f32.mrb[9].mxu1  ;;  %v882_v27 = vmul.f32 %v817_v16, %v1843_v33  ;;  %v1885_v29 = vadd.f32 %v245_v39, %v1801_v60  ;;  %v1888_v31 = vadd.f32 %v287_v40, %v1851_v49 }
  0xf1   :  { %1381 = vtanh.f32 %v946_v15  ;;  %v912_v30 = vmul.f32 0.7978846, %v847_v6  ;;  %v756_v9 = vmul.f32 0.044715, %v691_v23  ;;  %v1893_v34 = vadd.f32 %v249_v54, %v1805_v62 }
  0xf2   :  { %v617_v35 = vmul.f32 0.5, %v1821_v10  ;;  %v947_v36 = vmul.f32 0.7978846, %v882_v27  ;;  %v786_v37 = vadd.f32 1.0, %v721_v28  ;;  %v657_v38 = vmul.f32 %v1885_v29, %v1885_v29 }
  0xf3   :  { %v1898_v41 = vpop.f32.mrb[10].mxu0  ;;  %v1900_v39 = vpop.f32.mrb[10].mxu1  ;;  %v586_v42 = vmul.f32 0.5, %v1830_v20  ;;  %1383 = vtanh.f32 %v912_v30  ;;  %v821_v40 = vadd.f32 1.0, %v756_v9  ;;  %v692_v43 = vmul.f32 %v1888_v31, %v1888_v31 }
  0xf4   :  { %v1905_v44 = vpop.f32.mrb[11].mxu0  ;;  %v1907_v46 = vpop.f32.mrb[11].mxu1  ;;  %v621_v10 = vmul.f32 0.5, %v1833_v21  ;;  %1385 = vtanh.f32 %v947_v36  ;;  %v851_v47 = vmul.f32 %v786_v37, %v1857_v57  ;;  %v722_v48 = vmul.f32 0.044715, %v657_v38 }
  0xf5   :  { %v886_v51 = vmul.f32 %v821_v40, %v1861_v7  ;;  %v757_v52 = vmul.f32 0.044715, %v692_v43  ;;  %v661_v20 = vmul.f32 %v1893_v34, %v1893_v34  ;;  %v1915_v53 = vadd.f32 %v291_v58, %v1890_v32 }
  0xf6   :  { %v1372_v50 = vpop.eup %1371  ;;  %v916_v56 = vmul.f32 0.7978846, %v851_v47  ;;  %v787_v4 = vadd.f32 1.0, %v722_v48  ;;  %v1918_v21 = vadd.f32 %v251_v3, %v1805_v62 }
  0xf7   :  { %v1374_v54 = vpop.eup %1373  ;;  %v1036_v55 = vadd.f32 1.0, %v1372_v50  ;;  %v1920_v5 = vpop.f32.mrb[12].mxu0  ;;  %v951_v16 = vmul.f32 0.7978846, %v886_v51  ;;  %v822_v17 = vadd.f32 1.0, %v757_v52 }
  0xf8   :  { %v1922_v13 = vpop.f32.mrb[12].mxu1  ;;  %v1376_v14 = vpop.eup %1375  ;;  %v1071_v15 = vadd.f32 1.0, %v1374_v54  ;;  %v726_v6 = vmul.f32 0.044715, %v661_v20  ;;  %1387 = vtanh.f32 %v916_v56  ;;  %v852_v28 = vmul.f32 %v787_v4, %v1885_v29 }
  0xf9   :  { %v1378_v23 = vpop.eup %1377  ;;  %v1101_v58 = vmul.f32 %v1036_v55, %v1849_v45  ;;  %v1037_v27 = vadd.f32 1.0, %v1376_v14  ;;  %v1926_v30 = vpop.f32.mrb[13].mxu0  ;;  %1389 = vtanh.f32 %v951_v16  ;;  %v887_v38 = vmul.f32 %v822_v17, %v1888_v31 }
  0xfa   :  { %v1928_v3 = vpop.f32.mrb[13].mxu1  ;;  %v1380_v9 = vpop.eup %1379  ;;  %v1136_v36 = vmul.f32 %v1071_v15, %v1865_v12  ;;  %v1072_v37 = vadd.f32 1.0, %v1378_v23  ;;  %v917_v47 = vmul.f32 0.7978846, %v852_v28  ;;  %v791_v48 = vadd.f32 1.0, %v726_v6 }
  0xfb   :  { %v1382_v40 = vpop.eup %1381  ;;  %1166 = vst [vmem:[%s2637_s3] sm:$0xff] %v1101_v58  ;;  %v1102_v45 = vmul.f32 %v1037_v27, %v1874_v22  ;;  %v1041_v43 = vadd.f32 1.0, %v1380_v9  ;;  %v1936_v50 = vpop.f32.mrb[14].mxu1  ;;  %v587_v20 = vmul.f32 0.5, %v1836_v26  ;;  %v952_v54 = vmul.f32 0.7978846, %v887_v38 }
  0xfc   :  { %v1938_v51 = vpop.f32.mrb[14].mxu0  ;;  %1201 = vst [vmem:[%s2637_s3 + $0x118] sm:$0xff] %v1136_v36  ;;  %v1137_v12 = vmul.f32 %v1072_v37, %v617_v35  ;;  %v1076_v52 = vadd.f32 1.0, %v1382_v40  ;;  %v1944_v55 = vpop.f32.mrb[15].mxu1  ;;  %1391 = vtanh.f32 %v917_v47  ;;  %v856_v4 = vmul.f32 %v791_v48, %v1893_v34 }
  0xfd   :  { %v1302_v56 = vpop.f32.mrb[15].mxu0  ;;  %1167 = vst [vmem:[%s2637_s3 + $0x8] sm:$0xff] %v1102_v45  ;;  %v1106_v22 = vmul.f32 %v1041_v43, %v586_v42  ;;  %v696_v14 = vmul.f32 %v1915_v53, %v1915_v53  ;;  %v1952_v15 = vpop.permute.xlu1 %117  ;;  %v622_v16 = vmul.f32 0.5, %v1843_v33  ;;  %1393 = vtanh.f32 %v952_v54 }
  0xfe   :  { %2648 = vst [vmem:[#allocation4_spill] sm:$0xff] %v1952_v15  ;;  %v1384_v35 = vpop.eup %1383  ;;  %1202 = vst [vmem:[%s2637_s3 + $0x120] sm:$0xff] %v1137_v12  ;;  %v1141_v26 = vmul.f32 %v1076_v52, %v621_v10  ;;  %v662_v42 = vmul.f32 %v1918_v21, %v1918_v21  ;;  %v921_v23 = vmul.f32 0.7978846, %v856_v4  ;;  %v1965_v27 = vadd.f32 %v1863_v8, %v1890_v32 }
  0xff   :  { %v1386_v17 = vpop.eup %1385  ;;  %1171 = vst [vmem:[%s2637_s3 + $0x28] sm:$0xff] %v1106_v22  ;;  %v1042_v6 = vadd.f32 1.0, %v1384_v35  ;;  %v761_v58 = vmul.f32 0.044715, %v696_v14  ;;  %v1967_v28 = vpop.f32.mrb[16].mxu1  ;;  %v1974_v9 = vadd.f32 %v1869_v18, %v1807_v63  ;;  %v1978_v36 = vadd.f32 %v1871_v19, %v1952_v15 }
 0x100   :  { %1206 = vst [vmem:[%s2637_s3 + $0x140] sm:$0xff] %v1141_v26  ;;  %v1077_v33 = vadd.f32 1.0, %v1386_v17  ;;  %v727_v10 = vmul.f32 0.044715, %v662_v42  ;;  %v1980_v37 = vpop.f32.mrb[16].mxu0  ;;  %v1982_v8 = vpop.f32.mrb[17].mxu1  ;;  %1395 = vtanh.f32 %v921_v23  ;;  %v697_v18 = vmul.f32 %v1965_v27, %v1965_v27 }
 0x101   :  { %v1107_v38 = vmul.f32 %v1042_v6, %v587_v20  ;;  %v591_v40 = vmul.f32 0.5, %v1857_v57  ;;  %v826_v45 = vadd.f32 1.0, %v761_v58  ;;  %v1305_v43 = vpop.f32.mrb[17].mxu0  ;;  %v626_v48 = vmul.f32 0.5, %v1861_v7 }
 0x102   :  { %v1142_v47 = vmul.f32 %v1077_v33, %v622_v16  ;;  %v792_v12 = vadd.f32 1.0, %v727_v10  ;;  %v1388_v52 = vpop.eup %1387  ;;  %v592_v19 = vmul.f32 0.5, %v1885_v29  ;;  %v666_v57 = vmul.f32 %v1974_v9, %v1974_v9 }
 0x103   :  { %1172 = vst [vmem:[%s2637_s3 + $0x30] sm:$0xff] %v1107_v38  ;;  %v891_v20 = vmul.f32 %v826_v45, %v1915_v53  ;;  %v701_v54 = vmul.f32 %v1978_v36, %v1978_v36  ;;  %v1997_v7 = vpop.f32.mrb[18].mxu1  ;;  %v1999_v56 = vpop.f32.mrb[18].mxu0  ;;  %v1046_v4 = vadd.f32 1.0, %v1388_v52  ;;  %v762_v14 = vmul.f32 0.044715, %v697_v18 }
 0x104   :  { %v1390_v22 = vpop.eup %1389  ;;  %1207 = vst [vmem:[%s2637_s3 + $0x148] sm:$0xff] %v1142_v47  ;;  %v857_v29 = vmul.f32 %v792_v12, %v1918_v21  ;;  %v2007_v35 = vadd.f32 %v1879_v24, %v1807_v63  ;;  %v2009_v26 = vpop.f32.mrb[19].mxu1  ;;  %v731_v6 = vmul.f32 0.044715, %v666_v57  ;;  %v2013_v23 = vadd.f32 %v1881_v25, %v1952_v15 }
 0x105   :  { %v1308_v16 = vpop.f32.mrb[19].mxu0  ;;  %v1081_v42 = vadd.f32 1.0, %v1390_v22  ;;  %v956_v17 = vmul.f32 0.7978846, %v891_v20  ;;  %v1111_v58 = vmul.f32 %v1046_v4, %v591_v40  ;;  %v827_v10 = vadd.f32 1.0, %v762_v14 }
 0x106   :  { %v922_v33 = vmul.f32 0.7978846, %v857_v29  ;;  %v766_v38 = vmul.f32 0.044715, %v701_v54  ;;  %v1392_v45 = vpop.eup %1391  ;;  %v627_v47 = vmul.f32 0.5, %v1888_v31  ;;  %v796_v24 = vadd.f32 1.0, %v731_v6 }
 0x107   :  { %v1146_v43 = vmul.f32 %v1081_v42, %v626_v48  ;;  %1397 = vtanh.f32 %v956_v17  ;;  %v2016_v12 = vpop.f32.mrb[20].mxu1  ;;  %v2018_v18 = vpop.f32.mrb[20].mxu0  ;;  %1176 = vst [vmem:[%s2637_s3 + $0x50] sm:$0xff] %v1111_v58  ;;  %v1047_v25 = vadd.f32 1.0, %v1392_v45  ;;  %v892_v40 = vmul.f32 %v827_v10, %v1965_v27 }
 0x108   :  { %v1394_v52 = vpop.eup %1393  ;;  %1399 = vtanh.f32 %v922_v33  ;;  %v831_v20 = vadd.f32 1.0, %v766_v38  ;;  %v2024_v57 = vpop.f32.mrb[21].mxu1  ;;  %v596_v54 = vmul.f32 0.5, %v1893_v34  ;;  %v861_v22 = vmul.f32 %v796_v24, %v1974_v9 }
 0x109   :  { %v1311_v48 = vpop.f32.mrb[21].mxu0  ;;  %1211 = vst [vmem:[%s2637_s3 + $0x168] sm:$0xff] %v1146_v43  ;;  %v1082_v31 = vadd.f32 1.0, %v1394_v52  ;;  %v667_v4 = vmul.f32 %v2007_v35, %v2007_v35  ;;  %v1112_v29 = vmul.f32 %v1047_v25, %v592_v19  ;;  %v957_v14 = vmul.f32 0.7978846, %v892_v40  ;;  %v2036_v17 = vpop.permute.xlu0 %122 }
 0x10a   :  { %v896_v16 = vmul.f32 %v831_v20, %v1978_v36  ;;  %v702_v42 = vmul.f32 %v2013_v23, %v2013_v23  ;;  %2649 = vst [vmem:[#allocation5_spill] sm:$0xff] %v2036_v17  ;;  %v1396_v6 = vpop.eup %1395  ;;  %v926_v33 = vmul.f32 0.7978846, %v861_v22  ;;  %v2040_v34 = vadd.f32 %v1898_v41, %v1809_v0 }
 0x10b   :  { %v1147_v58 = vmul.f32 %v1082_v31, %v627_v47  ;;  %v732_v10 = vmul.f32 0.044715, %v667_v4  ;;  %v2042_v38 = vpop.f32.mrb[22].mxu1  ;;  %v2044_v45 = vpop.f32.mrb[22].mxu0  ;;  %1177 = vst [vmem:[%s2637_s3 + $0x58] sm:$0xff] %v1112_v29  ;;  %v1051_v19 = vadd.f32 1.0, %v1396_v6  ;;  %1401 = vtanh.f32 %v957_v14 }
 0x10c   :  { %v961_v43 = vmul.f32 0.7978846, %v896_v16  ;;  %v767_v24 = vmul.f32 0.044715, %v702_v42  ;;  %v2049_v52 = vpop.f32.mrb[23].mxu1  ;;  %v631_v41 = vmul.f32 0.5, %v1915_v53  ;;  %1403 = vtanh.f32 %v926_v33 }
 0x10d   :  { %1212 = vst [vmem:[%s2637_s3 + $0x170] sm:$0xff] %v1147_v58  ;;  %v797_v47 = vadd.f32 1.0, %v732_v10  ;;  %v671_v25 = vmul.f32 %v2040_v34, %v2040_v34  ;;  %v1314_v40 = vpop.f32.mrb[23].mxu0  ;;  %v1116_v20 = vmul.f32 %v1051_v19, %v596_v54  ;;  %v2059_v31 = vadd.f32 %v1900_v39, %v2036_v17 }
 0x10e   :  { %1405 = vtanh.f32 %v961_v43  ;;  %v832_v48 = vadd.f32 1.0, %v767_v24  ;;  %v597_v22 = vmul.f32 0.5, %v1918_v21  ;;  %v2065_v53 = vadd.f32 %v1905_v44, %v1809_v0 }
 0x10f   :  { %v862_v4 = vmul.f32 %v797_v47, %v2007_v35  ;;  %v736_v29 = vmul.f32 0.044715, %v671_v25  ;;  %v2067_v14 = vpop.f32.mrb[24].mxu1  ;;  %v2069_v16 = vpop.f32.mrb[24].mxu0  ;;  %1181 = vst [vmem:[%s2637_s3 + $0x78] sm:$0xff] %v1116_v20  ;;  %v632_v39 = vmul.f32 0.5, %v1965_v27  ;;  %v706_v21 = vmul.f32 %v2059_v31, %v2059_v31 }
 0x110   :  { %v897_v54 = vmul.f32 %v832_v48, %v2013_v23  ;;  %v2080_v42 = vadd.f32 %v1907_v46, %v2036_v17  ;;  %v2082_v44 = vpop.f32.mrb[25].mxu1  ;;  %v1317_v6 = vpop.f32.mrb[25].mxu0  ;;  %v601_v33 = vmul.f32 0.5, %v1974_v9  ;;  %v672_v27 = vmul.f32 %v2065_v53, %v2065_v53 }
 0x111   :  { %v1398_v58 = vpop.eup %1397  ;;  %v927_v10 = vmul.f32 0.7978846, %v862_v4  ;;  %v801_v19 = vadd.f32 1.0, %v736_v29  ;;  %v771_v25 = vmul.f32 0.044715, %v706_v21  ;;  %v2089_v40 = vadd.f32 %v1920_v5, %v1811_v1 }
 0x112   :  { %v1400_v43 = vpop.eup %1399  ;;  %v1086_v24 = vadd.f32 1.0, %v1398_v58  ;;  %v962_v47 = vmul.f32 0.7978846, %v897_v54  ;;  %v737_v48 = vmul.f32 0.044715, %v672_v27  ;;  %v707_v54 = vmul.f32 %v2080_v42, %v2080_v42 }
 0x113   :  { %v1052_v46 = vadd.f32 1.0, %v1400_v43  ;;  %1407 = vtanh.f32 %v927_v10  ;;  %v866_v20 = vmul.f32 %v801_v19, %v2040_v34  ;;  %v2092_v6 = vpop.f32.mrb[26].mxu1  ;;  %v2094_v9 = vpop.f32.mrb[26].mxu0  ;;  %v836_v29 = vadd.f32 1.0, %v771_v25 }
 0x114   :  { %v1151_v4 = vmul.f32 %v1086_v24, %v631_v41  ;;  %1409 = vtanh.f32 %v962_v47  ;;  %v2098_v21 = vpop.f32.mrb[27].mxu1  ;;  %v1320_v58 = vpop.f32.mrb[27].mxu0  ;;  %v636_v43 = vmul.f32 0.5, %v1978_v36  ;;  %v802_v17 = vadd.f32 1.0, %v737_v48 }
 0x115   :  { %v1117_v5 = vmul.f32 %v1052_v46, %v597_v22  ;;  %v931_v10 = vmul.f32 0.7978846, %v866_v20  ;;  %v1402_v19 = vpop.eup %1401  ;;  %v901_v41 = vmul.f32 %v836_v29, %v2059_v31  ;;  %v772_v27 = vmul.f32 0.044715, %v707_v54 }
 0x116   :  { %1216 = vst [vmem:[%s2637_s3 + $0x190] sm:$0xff] %v1151_v4  ;;  %v676_v24 = vmul.f32 %v2089_v40, %v2089_v40  ;;  %v2109_v47 = vadd.f32 %v1922_v13, %v1799_v59  ;;  %v1404_v22 = vpop.eup %1403  ;;  %v1087_v36 = vadd.f32 1.0, %v1402_v19  ;;  %v867_v25 = vmul.f32 %v802_v17, %v2065_v53 }
 0x117   :  { %1182 = vst [vmem:[%s2637_s3 + $0x80] sm:$0xff] %v1117_v5  ;;  %1411 = vtanh.f32 %v931_v10  ;;  %v2117_v46 = vadd.f32 %v1926_v30, %v1811_v1  ;;  %v2119_v20 = vpop.f32.mrb[28].mxu1  ;;  %v2121_v48 = vpop.f32.mrb[28].mxu0  ;;  %v1056_v13 = vadd.f32 1.0, %v1404_v22  ;;  %v966_v29 = vmul.f32 0.7978846, %v901_v41 }
 0x118   :  { %2650 = vst [vmem:[#allocation6_spill] sm:$0xff] %v2119_v20  ;;  %v1406_v4 = vpop.eup %1405  ;;  %v837_v54 = vadd.f32 1.0, %v772_v27  ;;  %v741_v58 = vmul.f32 0.044715, %v676_v24  ;;  %v1152_v15 = vmul.f32 %v1087_v36, %v632_v39  ;;  %v602_v5 = vmul.f32 0.5, %v2007_v35  ;;  %v2124_v19 = vpop.f32.mrb[29].mxu1 }
 0x119   :  { %v1091_v32 = vadd.f32 1.0, %v1406_v4  ;;  %v932_v10 = vmul.f32 0.7978846, %v867_v25  ;;  %v1323_v17 = vpop.f32.mrb[29].mxu0  ;;  %v1121_v49 = vmul.f32 %v1056_v13, %v601_v33  ;;  %1413 = vtanh.f32 %v966_v29 }
 0x11a   :  { %v902_v30 = vmul.f32 %v837_v54, %v2080_v42  ;;  %v806_v20 = vadd.f32 1.0, %v741_v58  ;;  %1217 = vst [vmem:[%s2637_s3 + $0x198] sm:$0xff] %v1152_v15  ;;  %v637_v27 = vmul.f32 0.5, %v2013_v23  ;;  %v648_v35 = vmul.f32 %v2109_v47, %v2109_v47 }
 0x11b   :  { %v1156_v41 = vmul.f32 %v1091_v32, %v636_v43  ;;  %1415 = vtanh.f32 %v932_v10  ;;  %v2133_v39 = vpop.f32.mrb[30].mxu1  ;;  %v2135_v24 = vpop.f32.mrb[30].mxu0  ;;  %1186 = vst [vmem:[%s2637_s3 + $0xa0] sm:$0xff] %v1121_v49  ;;  %v677_v32 = vmul.f32 %v2117_v46, %v2117_v46  ;;  %v2145_v15 = vadd.f32 %v1928_v3, %v1799_v59 }
 0x11c   :  { %v967_v33 = vmul.f32 0.7978846, %v902_v30  ;;  %v871_v22 = vmul.f32 %v806_v20, %v2089_v40  ;;  %v2147_v23 = vpop.f32.mrb[31].mxu1  ;;  %v1326_v43 = vpop.f32.mrb[31].mxu0  ;;  %v606_v49 = vmul.f32 0.5, %v2040_v34  ;;  %v2155_v20 = vadd.f32 %v1936_v50, %v1803_v61 }
 0x11d   :  { %v1408_v36 = vpop.eup %1407  ;;  %1221 = vst [vmem:[%s2637_s3 + $0x1b8] sm:$0xff] %v1156_v41  ;;  %v713_v25 = vmul.f32 0.044715, %v648_v35  ;;  %v2159_v4 = vadd.f32 %v1938_v51, %v1799_v59  ;;  %v742_v54 = vmul.f32 0.044715, %v677_v32  ;;  %v641_v10 = vmul.f32 0.5, %v2059_v31 }
 0x11e   :  { %v1410_v3 = vpop.eup %1409  ;;  %v1057_v13 = vadd.f32 1.0, %v1408_v36  ;;  %1417 = vtanh.f32 %v967_v33  ;;  %v936_v29 = vmul.f32 0.7978846, %v871_v22  ;;  %v649_v34 = vmul.f32 %v2145_v15, %v2145_v15 }
 0x11f   :  { %v1092_v58 = vadd.f32 1.0, %v1410_v3  ;;  %v778_v17 = vadd.f32 1.0, %v713_v25  ;;  %v2164_v30 = vpop.f32.mrb[32].mxu1  ;;  %v2166_v50 = vpop.f32.mrb[32].mxu0  ;;  %v807_v59 = vadd.f32 1.0, %v742_v54  ;;  %v2170_v51 = vadd.f32 %v1944_v55, %v1803_v61 }
 0x120   :  { %v1122_v41 = vmul.f32 %v1057_v13, %v602_v5  ;;  %1419 = vtanh.f32 %v936_v29  ;;  %v2172_v35 = vpop.f32.mrb[33].mxu1  ;;  %v1329_v33 = vpop.f32.mrb[33].mxu0  ;;  %v714_v43 = vmul.f32 0.044715, %v649_v34  ;;  %v653_v36 = vmul.f32 %v2155_v20, %v2155_v20 }
 0x121   :  { %2651 = vst [vmem:[#allocation7_spill] sm:$0xff] %v2172_v35  ;;  %v1412_v22 = vpop.eup %1411  ;;  %v1157_v31 = vmul.f32 %v1092_v58, %v637_v27  ;;  %v843_v32 = vmul.f32 %v778_v17, %v2109_v47  ;;  %v607_v25 = vmul.f32 0.5, %v2065_v53  ;;  %v872_v55 = vmul.f32 %v807_v59, %v2117_v46 }
 0x122   :  { %1187 = vst [vmem:[%s2637_s3 + $0xa8] sm:$0xff] %v1122_v41  ;;  %v1061_v5 = vadd.f32 1.0, %v1412_v22  ;;  %v650_v3 = vmul.f32 %v2159_v4, %v2159_v4  ;;  %v642_v27 = vmul.f32 0.5, %v2080_v42  ;;  %v779_v29 = vadd.f32 1.0, %v714_v43 }
 0x123   :  { %1222 = vst [vmem:[%s2637_s3 + $0x1c0] sm:$0xff] %v1157_v31  ;;  %v908_v13 = vmul.f32 0.7978846, %v843_v32  ;;  %v718_v54 = vmul.f32 0.044715, %v653_v36  ;;  %v1414_v58 = vpop.eup %1413  ;;  %v654_v53 = vmul.f32 %v2170_v51, %v2170_v51  ;;  %v2190_v59 = vpop.f32.mrb[34].mxu1 }
 0x124   :  { %v1126_v17 = vmul.f32 %v1061_v5, %v606_v49  ;;  %v937_v34 = vmul.f32 0.7978846, %v872_v55  ;;  %v715_v41 = vmul.f32 0.044715, %v650_v3  ;;  %v2192_v33 = vpop.f32.mrb[34].mxu0  ;;  %v1096_v35 = vadd.f32 1.0, %v1414_v58 }
 0x125   :  { %2652 = vst [vmem:[#allocation8_spill] sm:$0xff] %v2192_v33  ;;  %v1416_v22 = vpop.eup %1415  ;;  %1421 = vtanh.f32 %v908_v13  ;;  %v844_v31 = vmul.f32 %v779_v29, %v2145_v15  ;;  %v783_v42 = vadd.f32 1.0, %v718_v54  ;;  %v2195_v32 = vpop.f32.mrb[35].mxu1  ;;  %v719_v5 = vmul.f32 0.044715, %v654_v53 }
 0x126   :  { %v1332_v43 = vpop.f32.mrb[35].mxu0  ;;  %1191 = vst [vmem:[%s2637_s3 + $0xc8] sm:$0xff] %v1126_v17  ;;  %v1062_v49 = vadd.f32 1.0, %v1416_v22  ;;  %1423 = vtanh.f32 %v937_v34  ;;  %v780_v36 = vadd.f32 1.0, %v715_v41  ;;  %v1161_v55 = vmul.f32 %v1096_v35, %v641_v10 }
 0x127   :  { %v909_v3 = vmul.f32 0.7978846, %v844_v31  ;;  %v848_v33 = vmul.f32 %v783_v42, %v2155_v20  ;;  %v2203_v13 = vadd.f32 %v1967_v28, %v1801_v60  ;;  %v2205_v29 = vpop.f32.mrb[36].mxu1  ;;  %v2207_v54 = vpop.f32.mrb[36].mxu0  ;;  %v784_v22 = vadd.f32 1.0, %v719_v5 }
 0x128   :  { %v1418_v58 = vpop.eup %1417  ;;  %v1127_v43 = vmul.f32 %v1062_v49, %v607_v25  ;;  %v845_v17 = vmul.f32 %v780_v36, %v2159_v4  ;;  %v2212_v34 = vadd.f32 %v1980_v37, %v1803_v61  ;;  %v2214_v10 = vpop.f32.mrb[37].mxu1  ;;  %1226 = vst [vmem:[%s2637_s3 + $0x1e0] sm:$0x3] %v1161_v55  ;;  %v611_v41 = vmul.f32 0.5, %v2089_v40 }
 0x129   :  { %v1335_v35 = vpop.f32.mrb[37].mxu0  ;;  %v1097_v28 = vadd.f32 1.0, %v1418_v58  ;;  %1425 = vtanh.f32 %v909_v3  ;;  %v913_v53 = vmul.f32 0.7978846, %v848_v33  ;;  %v583_v61 = vmul.f32 0.5, %v2109_v47 }
 0x12a   :  { %v1420_v25 = vpop.eup %1419  ;;  %1192 = vst [vmem:[%s2637_s3 + $0xd0] sm:$0xff] %v1127_v43  ;;  %v910_v37 = vmul.f32 0.7978846, %v845_v17  ;;  %v849_v31 = vmul.f32 %v784_v22, %v2170_v51  ;;  %v658_v42 = vmul.f32 %v2203_v13, %v2203_v13  ;;  %v655_v40 = vmul.f32 %v2212_v34, %v2212_v34 }
 0x12b   :  { %v1162_v49 = vmul.f32 %v1097_v28, %v642_v27  ;;  %v1066_v36 = vadd.f32 1.0, %v1420_v25  ;;  %1427 = vtanh.f32 %v913_v53  ;;  %v2229_v33 = vpop.f32.mrb[38].mxu0  ;;  %v2233_v47 = vadd.f32 %v1982_v8, %v1801_v60 }
 0x12c   :  { %1429 = vtanh.f32 %v910_v37  ;;  %v914_v5 = vmul.f32 0.7978846, %v849_v31  ;;  %v723_v55 = vmul.f32 0.044715, %v658_v42  ;;  %v1338_v3 = vpop.f32.mrb[39].mxu0  ;;  %v2240_v43 = vadd.f32 %v1997_v7, %v1805_v62 }
 0x12d   :  { %1227 = vst [vmem:[%s2637_s3 + $0x1e8] sm:$0x3] %v1162_v49  ;;  %v1131_v27 = vmul.f32 %v1066_v36, %v611_v41  ;;  %v720_v58 = vmul.f32 0.044715, %v655_v40  ;;  %v2244_v17 = vadd.f32 %v1999_v56, %v1801_v60  ;;  %v612_v22 = vmul.f32 0.5, %v2117_v46 }
 0x12e   :  { %1431 = vtanh.f32 %v914_v5  ;;  %v788_v8 = vadd.f32 1.0, %v723_v55  ;;  %v659_v35 = vmul.f32 %v2233_v47, %v2233_v47  ;;  %v584_v41 = vmul.f32 0.5, %v2145_v15 }
 0x12f   :  { %v1422_v28 = vpop.eup %1421  ;;  %1196 = vst [vmem:[%s2637_s3 + $0xf0] sm:$0xff] %v1131_v27  ;;  %v588_v7 = vmul.f32 0.5, %v2155_v20  ;;  %v785_v53 = vadd.f32 1.0, %v720_v58  ;;  %v663_v60 = vmul.f32 %v2240_v43, %v2240_v43  ;;  %v660_v31 = vmul.f32 %v2244_v17, %v2244_v17 }
 0x130   :  { %v1424_v56 = vpop.eup %1423  ;;  %v1038_v46 = vadd.f32 1.0, %v1422_v28  ;;  %v853_v25 = vmul.f32 %v788_v8, %v2203_v13  ;;  %v724_v37 = vmul.f32 0.044715, %v659_v35  ;;  %v2262_v15 = vadd.f32 %v2009_v26, %v1805_v62 }
 0x131   :  { %v1067_v42 = vadd.f32 1.0, %v1424_v56  ;;  %v850_v49 = vmul.f32 %v785_v53, %v2212_v34  ;;  %v728_v36 = vmul.f32 0.044715, %v663_v60  ;;  %v725_v55 = vmul.f32 0.044715, %v660_v31 }
 0x132   :  { %v1103_v20 = vmul.f32 %v1038_v46, %v583_v61  ;;  %v918_v40 = vmul.f32 0.7978846, %v853_v25  ;;  %v789_v5 = vadd.f32 1.0, %v724_v37  ;;  %v585_v58 = vmul.f32 0.5, %v2159_v4 }
 0x133   :  { %v1426_v3 = vpop.eup %1425  ;;  %v1132_v27 = vmul.f32 %v1067_v42, %v612_v22  ;;  %v915_v8 = vmul.f32 0.7978846, %v850_v49  ;;  %v793_v35 = vadd.f32 1.0, %v728_v36  ;;  %v790_v26 = vadd.f32 1.0, %v725_v55 }
 0x134   :  { %1168 = vst [vmem:[%s2637_s3 + $0x10] sm:$0xff] %v1103_v20  ;;  %v1039_v28 = vadd.f32 1.0, %v1426_v3  ;;  %1433 = vtanh.f32 %v918_v40  ;;  %v854_v53 = vmul.f32 %v789_v5, %v2233_v47  ;;  %v664_v4 = vmul.f32 %v2262_v15, %v2262_v15 }
 0x135   :  { %v1428_v60 = vpop.eup %1427  ;;  %1197 = vst [vmem:[%s2637_s3 + $0xf8] sm:$0xff] %v1132_v27  ;;  %1435 = vtanh.f32 %v915_v8  ;;  %v858_v61 = vmul.f32 %v793_v35, %v2240_v43  ;;  %v2277_v22 = vadd.f32 %v2016_v12, %v1807_v63  ;;  %v855_v31 = vmul.f32 %v790_v26, %v2244_v17 }
 0x136   :  { %v1430_v56 = vpop.eup %1429  ;;  %v1104_v46 = vmul.f32 %v1039_v28, %v584_v41  ;;  %v1043_v25 = vadd.f32 1.0, %v1428_v60  ;;  %v919_v37 = vmul.f32 0.7978846, %v854_v53  ;;  %v589_v49 = vmul.f32 0.5, %v2170_v51 }
 0x137   :  { %v1040_v42 = vadd.f32 1.0, %v1430_v56  ;;  %v923_v36 = vmul.f32 0.7978846, %v858_v61  ;;  %v729_v20 = vmul.f32 0.044715, %v664_v4  ;;  %v668_v41 = vmul.f32 %v2277_v22, %v2277_v22 }
 0x138   :  { %v1432_v40 = vpop.eup %1431  ;;  %1169 = vst [vmem:[%s2637_s3 + $0x18] sm:$0xff] %v1104_v46  ;;  %v1108_v5 = vmul.f32 %v1043_v25, %v588_v7  ;;  %1437 = vtanh.f32 %v919_v37  ;;  %v920_v12 = vmul.f32 0.7978846, %v855_v31  ;;  %v2291_v8 = vadd.f32 %v2018_v18, %v1805_v62 }
 0x139   :  { %v1105_v55 = vmul.f32 %v1040_v42, %v585_v58  ;;  %v1044_v3 = vadd.f32 1.0, %v1432_v40  ;;  %1439 = vtanh.f32 %v923_v36  ;;  %v794_v27 = vadd.f32 1.0, %v729_v20 }
 0x13a   :  { %1173 = vst [vmem:[%s2637_s3 + $0x38] sm:$0xff] %v1108_v5  ;;  %1441 = vtanh.f32 %v920_v12  ;;  %v733_v51 = vmul.f32 0.044715, %v668_v41  ;;  %v2295_v7 = vadd.f32 %v2024_v57, %v1807_v63  ;;  %v2304_v28 = vadd.f32 %v2042_v38, %v1809_v0 }
 0x13b   :  { %1170 = vst.msk [vmem:[%s2637_s3 + $0x20] sm:$0xff] %vm125_vm0, %v1105_v55  ;;  %v1109_v58 = vmul.f32 %v1044_v3, %v589_v49  ;;  %v859_v35 = vmul.f32 %v794_v27, %v2262_v15  ;;  %v2308_v62 = vadd.f32 %v2044_v45, %v1807_v63  ;;  %v593_v18 = vmul.f32 0.5, %v2203_v13 }
 0x13c   :  { %v590_v57 = vmul.f32 0.5, %v2212_v34  ;;  %v798_v53 = vadd.f32 1.0, %v733_v51  ;;  %v665_v26 = vmul.f32 %v2291_v8, %v2291_v8  ;;  %v594_v60 = vmul.f32 0.5, %v2233_v47 }
 0x13d   :  { %1174 = vst [vmem:[%s2637_s3 + $0x40] sm:$0xff] %v1109_v58  ;;  %v924_v38 = vmul.f32 0.7978846, %v859_v35  ;;  %v669_v61 = vmul.f32 %v2295_v7, %v2295_v7  ;;  %v673_v63 = vmul.f32 %v2304_v28, %v2304_v28  ;;  %v598_v13 = vmul.f32 0.5, %v2240_v43 }
 0x13e   :  { %v1434_v45 = vpop.eup %1433  ;;  %v863_v34 = vmul.f32 %v798_v53, %v2277_v22  ;;  %v730_v4 = vmul.f32 0.044715, %v665_v26  ;;  %v670_v56 = vmul.f32 %v2308_v62, %v2308_v62  ;;  %v2328_v43 = vadd.f32 %v2049_v52, %v1809_v0 }
 0x13f   :  { %v1436_v46 = vpop.eup %1435  ;;  %v1048_v25 = vadd.f32 1.0, %v1434_v45  ;;  %1443 = vtanh.f32 %v924_v38  ;;  %v734_v47 = vmul.f32 0.044715, %v669_v61  ;;  %v738_v37 = vmul.f32 0.044715, %v673_v63 }
 0x140   :  { %v1045_v31 = vadd.f32 1.0, %v1436_v46  ;;  %v928_v42 = vmul.f32 0.7978846, %v863_v34  ;;  %v795_v49 = vadd.f32 1.0, %v730_v4  ;;  %v735_v36 = vmul.f32 0.044715, %v670_v56 }
 0x141   :  { %v1113_v20 = vmul.f32 %v1048_v25, %v593_v18  ;;  %v799_v40 = vadd.f32 1.0, %v734_v47  ;;  %v803_v5 = vadd.f32 1.0, %v738_v37  ;;  %v595_v58 = vmul.f32 0.5, %v2244_v17 }
 0x142   :  { %v1438_v12 = vpop.eup %1437  ;;  %v1110_v41 = vmul.f32 %v1045_v31, %v590_v57  ;;  %1445 = vtanh.f32 %v928_v42  ;;  %v860_v55 = vmul.f32 %v795_v49, %v2291_v8  ;;  %v800_v3 = vadd.f32 1.0, %v735_v36 }
 0x143   :  { %v1440_v27 = vpop.eup %1439  ;;  %1178 = vst [vmem:[%s2637_s3 + $0x60] sm:$0xff] %v1113_v20  ;;  %v1049_v51 = vadd.f32 1.0, %v1438_v12  ;;  %v864_v35 = vmul.f32 %v799_v40, %v2295_v7  ;;  %v868_v18 = vmul.f32 %v803_v5, %v2304_v28  ;;  %v674_v38 = vmul.f32 %v2328_v43, %v2328_v43 }
 0x144   :  { %v1442_v52 = vpop.eup %1441  ;;  %1175 = vst.msk [vmem:[%s2637_s3 + $0x48] sm:$0xff] %vm125_vm0, %v1110_v41  ;;  %v1053_v57 = vadd.f32 1.0, %v1440_v27  ;;  %v925_v53 = vmul.f32 0.7978846, %v860_v55  ;;  %v865_v26 = vmul.f32 %v800_v3, %v2308_v62  ;;  %v2349_v25 = vadd.f32 %v2067_v14, %v1811_v1 }
 0x145   :  { %v1114_v61 = vmul.f32 %v1049_v51, %v594_v60  ;;  %v1050_v63 = vadd.f32 1.0, %v1442_v52  ;;  %v929_v17 = vmul.f32 0.7978846, %v864_v35  ;;  %v933_v45 = vmul.f32 0.7978846, %v868_v18 }
 0x146   :  { %v1118_v34 = vmul.f32 %v1053_v57, %v598_v13  ;;  %1447 = vtanh.f32 %v925_v53  ;;  %v930_v4 = vmul.f32 0.7978846, %v865_v26  ;;  %v739_v56 = vmul.f32 0.044715, %v674_v38 }
 0x147   :  { %1179 = vst [vmem:[%s2637_s3 + $0x68] sm:$0xff] %v1114_v61  ;;  %v1115_v46 = vmul.f32 %v1050_v63, %v595_v58  ;;  %1449 = vtanh.f32 %v929_v17  ;;  %v2353_v60 = vadd.f32 %v2069_v16, %v1809_v0  ;;  %v2360_v47 = vadd.f32 %v2082_v44, %v1811_v1 }
 0x148   :  { %1183 = vst [vmem:[%s2637_s3 + $0x88] sm:$0xff] %v1118_v34  ;;  %1451 = vtanh.f32 %v933_v45  ;;  %v804_v13 = vadd.f32 1.0, %v739_v56  ;;  %v2364_v37 = vadd.f32 %v2092_v6, %v1813_v2  ;;  %v599_v0 = vmul.f32 0.5, %v2262_v15 }
 0x149   :  { %v1444_v14 = vpop.eup %1443  ;;  %1180 = vst.msk [vmem:[%s2637_s3 + $0x70] sm:$0xff] %vm125_vm0, %v1115_v46  ;;  %v603_v16 = vmul.f32 0.5, %v2277_v22  ;;  %1453 = vtanh.f32 %v930_v4  ;;  %v678_v31 = vmul.f32 %v2349_v25, %v2349_v25  ;;  %v600_v42 = vmul.f32 0.5, %v2291_v8 }
 0x14a   :  { %v1054_v44 = vadd.f32 1.0, %v1444_v14  ;;  %v869_v6 = vmul.f32 %v804_v13, %v2328_v43  ;;  %v675_v49 = vmul.f32 %v2353_v60, %v2353_v60  ;;  %v604_v36 = vmul.f32 0.5, %v2295_v7  ;;  %v2653_v13 = vld [vmem:[#allocation6_spill] sm:$0xff] }
 0x14b   :  { %v743_v20 = vmul.f32 0.044715, %v678_v31  ;;  %v679_v15 = vmul.f32 %v2360_v47, %v2360_v47  ;;  %v683_v22 = vmul.f32 %v2364_v37, %v2364_v37  ;;  %v2385_v8 = vadd.f32 %v2094_v9, %v1811_v1 }
 0x14c   :  { %v1446_v40 = vpop.eup %1445  ;;  %v1119_v5 = vmul.f32 %v1054_v44, %v599_v0  ;;  %v934_v12 = vmul.f32 0.7978846, %v869_v6  ;;  %v740_v41 = vmul.f32 0.044715, %v675_v49  ;;  %v608_v7 = vmul.f32 0.5, %v2304_v28 }
 0x14d   :  { %v1058_v55 = vadd.f32 1.0, %v1446_v40  ;;  %v808_v3 = vadd.f32 1.0, %v743_v20  ;;  %v744_v27 = vmul.f32 0.044715, %v679_v15  ;;  %v748_v51 = vmul.f32 0.044715, %v683_v22 }
 0x14e   :  { %1184 = vst [vmem:[%s2637_s3 + $0x90] sm:$0xff] %v1119_v5  ;;  %1455 = vtanh.f32 %v934_v12  ;;  %v805_v58 = vadd.f32 1.0, %v740_v41  ;;  %v680_v35 = vmul.f32 %v2385_v8, %v2385_v8  ;;  %v605_v53 = vmul.f32 0.5, %v2308_v62 }
 0x14f   :  { %v1123_v18 = vmul.f32 %v1058_v55, %v603_v16  ;;  %v873_v52 = vmul.f32 %v808_v3, %v2349_v25  ;;  %v809_v1 = vadd.f32 1.0, %v744_v27  ;;  %v813_v9 = vadd.f32 1.0, %v748_v51 }
 0x150   :  { %v1448_v57 = vpop.eup %1447  ;;  %v870_v26 = vmul.f32 %v805_v58, %v2353_v60  ;;  %v745_v38 = vmul.f32 0.044715, %v680_v35  ;;  %v2398_v61 = vadd.f32 %v2098_v21, %v1813_v2  ;;  %v2407_v14 = vadd.f32 %v2653_v13, %v1823_v11 }
 0x151   :  { %v1450_v28 = vpop.eup %1449  ;;  %1188 = vst [vmem:[%s2637_s3 + $0xb0] sm:$0xff] %v1123_v18  ;;  %v1055_v63 = vadd.f32 1.0, %v1448_v57  ;;  %v938_v17 = vmul.f32 0.7978846, %v873_v52  ;;  %v874_v45 = vmul.f32 %v809_v1, %v2360_v47  ;;  %v878_v34 = vmul.f32 %v813_v9, %v2364_v37 }
 0x152   :  { %v1452_v4 = vpop.eup %1451  ;;  %v1059_v62 = vadd.f32 1.0, %v1450_v28  ;;  %v935_v56 = vmul.f32 0.7978846, %v870_v26  ;;  %v810_v46 = vadd.f32 1.0, %v745_v38  ;;  %v684_v22 = vmul.f32 %v2398_v61, %v2398_v61 }
 0x153   :  { %v1454_v21 = vpop.eup %1453  ;;  %v1120_v0 = vmul.f32 %v1055_v63, %v600_v42  ;;  %v1063_v16 = vadd.f32 1.0, %v1452_v4  ;;  %1457 = vtanh.f32 %v938_v17  ;;  %v939_v31 = vmul.f32 0.7978846, %v874_v45 }
 0x154   :  { %v1124_v44 = vmul.f32 %v1059_v62, %v604_v36  ;;  %v1060_v6 = vadd.f32 1.0, %v1454_v21  ;;  %1459 = vtanh.f32 %v935_v56  ;;  %v943_v49 = vmul.f32 0.7978846, %v878_v34 }
 0x155   :  { %1185 = vst.msk [vmem:[%s2637_s3 + $0x98] sm:$0xff] %vm125_vm0, %v1120_v0  ;;  %v1128_v20 = vmul.f32 %v1063_v16, %v608_v7  ;;  %1461 = vtanh.f32 %v939_v31  ;;  %v875_v15 = vmul.f32 %v810_v46, %v2385_v8  ;;  %v609_v36 = vmul.f32 0.5, %v2328_v43  ;;  %v2654_v7 = vld [vmem:[#allocation2_spill] sm:$0xff] }
 0x156   :  { %1189 = vst [vmem:[%s2637_s3 + $0xb8] sm:$0xff] %v1124_v44  ;;  %v1125_v42 = vmul.f32 %v1060_v6, %v605_v53  ;;  %1463 = vtanh.f32 %v943_v49  ;;  %v688_v40 = vmul.f32 %v2407_v14, %v2407_v14  ;;  %v749_v12 = vmul.f32 0.044715, %v684_v22 }
 0x157   :  { %1193 = vst [vmem:[%s2637_s3 + $0xd8] sm:$0xff] %v1128_v20  ;;  %v940_v5 = vmul.f32 0.7978846, %v875_v15  ;;  %v2427_v41 = vadd.f32 %v2121_v48, %v1813_v2  ;;  %v2431_v55 = vadd.f32 %v2124_v19, %v1823_v11  ;;  %v613_v43 = vmul.f32 0.5, %v2349_v25 }
 0x158   :  { %v1456_v3 = vpop.eup %1455  ;;  %1190 = vst.msk [vmem:[%s2637_s3 + $0xc0] sm:$0xff] %vm125_vm0, %v1125_v42  ;;  %v610_v27 = vmul.f32 0.5, %v2353_v60  ;;  %v753_v51 = vmul.f32 0.044715, %v688_v40  ;;  %v2441_v58 = vadd.f32 %v2133_v39, %v2654_v7  ;;  %v814_v48 = vadd.f32 1.0, %v749_v12  ;;  %v2655_v12 = vld [vmem:[#allocation3_spill] sm:$0xff] }
 0x159   :  { %v1064_v2 = vadd.f32 1.0, %v1456_v3  ;;  %1465 = vtanh.f32 %v940_v5  ;;  %v2445_v19 = vadd.f32 %v2135_v24, %v1823_v11  ;;  %v614_v35 = vmul.f32 0.5, %v2360_v47 }
 0x15a   :  { %v818_v18 = vadd.f32 1.0, %v753_v51  ;;  %v685_v25 = vmul.f32 %v2427_v41, %v2427_v41  ;;  %v689_v60 = vmul.f32 %v2431_v55, %v2431_v55  ;;  %v618_v39 = vmul.f32 0.5, %v2364_v37 }
 0x15b   :  { %v1129_v52 = vmul.f32 %v1064_v2, %v609_v36  ;;  %v879_v1 = vmul.f32 %v814_v48, %v2398_v61  ;;  %v693_v9 = vmul.f32 %v2441_v58, %v2441_v58  ;;  %v615_v11 = vmul.f32 0.5, %v2385_v8 }
 0x15c   :  { %v883_v24 = vmul.f32 %v818_v18, %v2407_v14  ;;  %v750_v47 = vmul.f32 0.044715, %v685_v25  ;;  %v754_v57 = vmul.f32 0.044715, %v689_v60  ;;  %v690_v37 = vmul.f32 %v2445_v19, %v2445_v19 }
 0x15d   :  { %v1458_v53 = vpop.eup %1457  ;;  %1194 = vst [vmem:[%s2637_s3 + $0xe0] sm:$0xff] %v1129_v52  ;;  %v944_v26 = vmul.f32 0.7978846, %v879_v1  ;;  %v758_v38 = vmul.f32 0.044715, %v693_v9  ;;  %v2465_v28 = vadd.f32 %v2147_v23, %v2654_v7  ;;  %v2481_v3 = vadd.f32 %v2164_v30, %v2655_v12  ;;  %v2657_v9 = vld [vmem:[#allocation4_spill] sm:$0xff] }
 0x15e   :  { %v1460_v63 = vpop.eup %1459  ;;  %v1068_v8 = vadd.f32 1.0, %v1458_v53  ;;  %v948_v17 = vmul.f32 0.7978846, %v883_v24  ;;  %v815_v45 = vadd.f32 1.0, %v750_v47  ;;  %v819_v34 = vadd.f32 1.0, %v754_v57 }
 0x15f   :  { %v1462_v4 = vpop.eup %1461  ;;  %v1065_v62 = vadd.f32 1.0, %v1460_v63  ;;  %1467 = vtanh.f32 %v944_v26  ;;  %v823_v56 = vadd.f32 1.0, %v758_v38  ;;  %v755_v46 = vmul.f32 0.044715, %v690_v37  ;;  %v2658_v63 = vld [vmem:[#allocation8_spill] sm:$0xff] }
 0x160   :  { %v1464_v13 = vpop.eup %1463  ;;  %v1133_v21 = vmul.f32 %v1068_v8, %v613_v43  ;;  %v1069_v0 = vadd.f32 1.0, %v1462_v4  ;;  %1469 = vtanh.f32 %v948_v17  ;;  %v880_v16 = vmul.f32 %v815_v45, %v2427_v41 }
 0x161   :  { %v1130_v31 = vmul.f32 %v1065_v62, %v610_v27  ;;  %v1073_v44 = vadd.f32 1.0, %v1464_v13  ;;  %v884_v23 = vmul.f32 %v819_v34, %v2431_v55  ;;  %v888_v6 = vmul.f32 %v823_v56, %v2441_v58 }
 0x162   :  { %1198 = vst [vmem:[%s2637_s3 + $0x100] sm:$0xff] %v1133_v21  ;;  %v1134_v49 = vmul.f32 %v1069_v0, %v614_v35  ;;  %v945_v20 = vmul.f32 0.7978846, %v880_v16  ;;  %v820_v15 = vadd.f32 1.0, %v755_v46  ;;  %v694_v22 = vmul.f32 %v2465_v28, %v2465_v28 }
 0x163   :  { %v1466_v42 = vpop.eup %1465  ;;  %1195 = vst.msk [vmem:[%s2637_s3 + $0xe8] sm:$0xff] %vm125_vm0, %v1130_v31  ;;  %v1138_v36 = vmul.f32 %v1073_v44, %v618_v39  ;;  %v949_v40 = vmul.f32 0.7978846, %v884_v23  ;;  %v953_v5 = vmul.f32 0.7978846, %v888_v6  ;;  %v698_v2 = vmul.f32 %v2481_v3, %v2481_v3  ;;  %v2656_v39 = vld [vmem:[#allocation7_spill] sm:$0xff] }
 0x164   :  { %1199 = vst [vmem:[%s2637_s3 + $0x108] sm:$0xff] %v1134_v49  ;;  %v1070_v43 = vadd.f32 1.0, %v1466_v42  ;;  %1471 = vtanh.f32 %v945_v20  ;;  %v885_v27 = vmul.f32 %v820_v15, %v2445_v19  ;;  %v759_v51 = vmul.f32 0.044715, %v694_v22 }
 0x165   :  { %1203 = vst [vmem:[%s2637_s3 + $0x128] sm:$0xff] %v1138_v36  ;;  %1473 = vtanh.f32 %v949_v40  ;;  %v2494_v30 = vadd.f32 %v2166_v50, %v2654_v7  ;;  %v619_v25 = vmul.f32 0.5, %v2398_v61  ;;  %v763_v60 = vmul.f32 0.044715, %v698_v2  ;;  %v2659_v36 = vld [vmem:[#allocation5_spill] sm:$0xff] }
 0x166   :  { %v1135_v48 = vmul.f32 %v1070_v43, %v615_v11  ;;  %1475 = vtanh.f32 %v953_v5  ;;  %v950_v35 = vmul.f32 0.7978846, %v885_v27  ;;  %v824_v18 = vadd.f32 1.0, %v759_v51 }
 0x167   :  { %v695_v52 = vmul.f32 %v2494_v30, %v2494_v30  ;;  %v2501_v1 = vadd.f32 %v2656_v39, %v2655_v12  ;;  %v623_v50 = vmul.f32 0.5, %v2407_v14  ;;  %v2511_v61 = vadd.f32 %v2190_v59, %v2657_v9 }
 0x168   :  { %1200 = vst.msk [vmem:[%s2637_s3 + $0x110] sm:$0xff] %vm125_vm0, %v1135_v48  ;;  %1477 = vtanh.f32 %v950_v35  ;;  %v889_v7 = vmul.f32 %v824_v18, %v2465_v28  ;;  %v620_v24 = vmul.f32 0.5, %v2427_v41  ;;  %v828_v47 = vadd.f32 1.0, %v763_v60 }
 0x169   :  { %v1468_v11 = vpop.eup %1467  ;;  %v760_v57 = vmul.f32 0.044715, %v695_v52  ;;  %v699_v53 = vmul.f32 %v2501_v1, %v2501_v1  ;;  %v703_v14 = vmul.f32 %v2511_v61, %v2511_v61  ;;  %v2520_v8 = vadd.f32 %v2658_v63, %v2655_v12 }
 0x16a   :  { %v1470_v26 = vpop.eup %1469  ;;  %v1074_v38 = vadd.f32 1.0, %v1468_v11  ;;  %v954_v37 = vmul.f32 0.7978846, %v889_v7  ;;  %v893_v17 = vmul.f32 %v828_v47, %v2481_v3  ;;  %v624_v4 = vmul.f32 0.5, %v2431_v55 }
 0x16b   :  { %v1078_v59 = vadd.f32 1.0, %v1470_v26  ;;  %v825_v45 = vadd.f32 1.0, %v760_v57  ;;  %v764_v41 = vmul.f32 0.044715, %v699_v53  ;;  %v768_v62 = vmul.f32 0.044715, %v703_v14 }
 0x16c   :  { %v1139_v34 = vmul.f32 %v1074_v38, %v619_v25  ;;  %1479 = vtanh.f32 %v954_v37  ;;  %v958_v46 = vmul.f32 0.7978846, %v893_v17  ;;  %v628_v16 = vmul.f32 0.5, %v2441_v58 }
 0x16d   :  { %v1143_v56 = vmul.f32 %v1078_v59, %v623_v50  ;;  %v890_v13 = vmul.f32 %v825_v45, %v2494_v30  ;;  %v829_v21 = vadd.f32 1.0, %v764_v41  ;;  %v833_v31 = vadd.f32 1.0, %v768_v62 }
 0x16e   :  { %v1472_v0 = vpop.eup %1471  ;;  %1204 = vst [vmem:[%s2637_s3 + $0x130] sm:$0xff] %v1139_v34  ;;  %v700_v44 = vmul.f32 %v2520_v8, %v2520_v8  ;;  %v2533_v55 = vadd.f32 %v2195_v32, %v2657_v9  ;;  %1481 = vtanh.f32 %v958_v46  ;;  %v2542_v40 = vadd.f32 %v2205_v29, %v2659_v36 }
 0x16f   :  { %v1474_v23 = vpop.eup %1473  ;;  %1208 = vst [vmem:[%s2637_s3 + $0x150] sm:$0xff] %v1143_v56  ;;  %v1075_v6 = vadd.f32 1.0, %v1472_v0  ;;  %v955_v49 = vmul.f32 0.7978846, %v890_v13  ;;  %v894_v20 = vmul.f32 %v829_v21, %v2501_v1  ;;  %v898_v22 = vmul.f32 %v833_v31, %v2511_v61 }
 0x170   :  { %v1476_v15 = vpop.eup %1475  ;;  %v1079_v58 = vadd.f32 1.0, %v1474_v23  ;;  %v765_v42 = vmul.f32 0.044715, %v700_v44  ;;  %v704_v48 = vmul.f32 %v2533_v55, %v2533_v55  ;;  %v625_v29 = vmul.f32 0.5, %v2445_v19 }
 0x171   :  { %v1140_v32 = vmul.f32 %v1075_v6, %v620_v24  ;;  %v1083_v5 = vadd.f32 1.0, %v1476_v15  ;;  %1483 = vtanh.f32 %v955_v49  ;;  %v959_v12 = vmul.f32 0.7978846, %v894_v20 }
 0x172   :  { %v1478_v43 = vpop.eup %1477  ;;  %v1144_v27 = vmul.f32 %v1079_v58, %v624_v4  ;;  %v963_v51 = vmul.f32 0.7978846, %v898_v22  ;;  %v830_v2 = vadd.f32 1.0, %v765_v42  ;;  %v769_v60 = vmul.f32 0.044715, %v704_v48 }
 0x173   :  { %1205 = vst.msk [vmem:[%s2637_s3 + $0x138] sm:$0xff] %vm125_vm0, %v1140_v32  ;;  %v1148_v35 = vmul.f32 %v1083_v5, %v628_v16  ;;  %v1080_v18 = vadd.f32 1.0, %v1478_v43  ;;  %1485 = vtanh.f32 %v959_v12  ;;  %v708_v52 = vmul.f32 %v2542_v40, %v2542_v40 }
 0x174   :  { %1209 = vst [vmem:[%s2637_s3 + $0x158] sm:$0xff] %v1144_v27  ;;  %1487 = vtanh.f32 %v963_v51  ;;  %v895_v25 = vmul.f32 %v830_v2, %v2520_v8  ;;  %v2562_v19 = vadd.f32 %v2207_v54, %v2657_v9  ;;  %v2566_v50 = vadd.f32 %v2214_v10, %v2659_v36 }
 0x175   :  { %1213 = vst [vmem:[%s2637_s3 + $0x178] sm:$0xff] %v1148_v35  ;;  %v1145_v39 = vmul.f32 %v1080_v18, %v625_v29  ;;  %v2570_v7 = vadd.f32 %v2229_v33, %v2659_v36  ;;  %v834_v47 = vadd.f32 1.0, %v769_v60  ;;  %v773_v57 = vmul.f32 0.044715, %v708_v52 }
 0x176   :  { %v1480_v11 = vpop.eup %1479  ;;  %v960_v24 = vmul.f32 0.7978846, %v895_v25  ;;  %v629_v54 = vmul.f32 0.5, %v2465_v28  ;;  %v705_v10 = vmul.f32 %v2562_v19, %v2562_v19  ;;  %v709_v26 = vmul.f32 %v2566_v50, %v2566_v50 }
 0x177   :  { %1210 = vst.msk [vmem:[%s2637_s3 + $0x160] sm:$0xff] %vm125_vm0, %v1145_v39  ;;  %v1084_v9 = vadd.f32 1.0, %v1480_v11  ;;  %v899_v53 = vmul.f32 %v834_v47, %v2533_v55  ;;  %v838_v33 = vadd.f32 1.0, %v773_v57  ;;  %v633_v14 = vmul.f32 0.5, %v2481_v3 }
 0x178   :  { %1489 = vtanh.f32 %v960_v24  ;;  %v1482_v38 = vpop.eup %1481  ;;  %v770_v63 = vmul.f32 0.044715, %v705_v10  ;;  %v710_v59 = vmul.f32 %v2570_v7, %v2570_v7  ;;  %v774_v41 = vmul.f32 0.044715, %v709_v26 }
 0x179   :  { %v1149_v37 = vmul.f32 %v1084_v9, %v629_v54  ;;  %v1088_v28 = vadd.f32 1.0, %v1482_v38  ;;  %v964_v17 = vmul.f32 0.7978846, %v899_v53  ;;  %v903_v45 = vmul.f32 %v838_v33, %v2542_v40 }
 0x17a   :  { %v630_v4 = vmul.f32 0.5, %v2494_v30  ;;  %v835_v62 = vadd.f32 1.0, %v770_v63  ;;  %v775_v56 = vmul.f32 0.044715, %v710_v59  ;;  %v634_v0 = vmul.f32 0.5, %v2501_v1 }
 0x17b   :  { %v1484_v34 = vpop.eup %1483  ;;  %1214 = vst [vmem:[%s2637_s3 + $0x180] sm:$0xff] %v1149_v37  ;;  %v1153_v46 = vmul.f32 %v1088_v28, %v633_v14  ;;  %1491 = vtanh.f32 %v964_v17  ;;  %v968_v13 = vmul.f32 0.7978846, %v903_v45  ;;  %v839_v31 = vadd.f32 1.0, %v774_v41 }
 0x17c   :  { %v1085_v3 = vadd.f32 1.0, %v1484_v34  ;;  %v900_v16 = vmul.f32 %v835_v62, %v2562_v19  ;;  %v840_v44 = vadd.f32 1.0, %v775_v56  ;;  %v638_v49 = vmul.f32 0.5, %v2511_v61 }
 0x17d   :  { %v1486_v21 = vpop.eup %1485  ;;  %1218 = vst [vmem:[%s2637_s3 + $0x1a0] sm:$0xff] %v1153_v46  ;;  %1493 = vtanh.f32 %v968_v13  ;;  %v904_v58 = vmul.f32 %v839_v31, %v2566_v50  ;;  %v635_v61 = vmul.f32 0.5, %v2520_v8  ;;  %v639_v51 = vmul.f32 0.5, %v2533_v55 }
 0x17e   :  { %v1488_v23 = vpop.eup %1487  ;;  %v1150_v6 = vmul.f32 %v1085_v3, %v630_v4  ;;  %v1089_v30 = vadd.f32 1.0, %v1486_v21  ;;  %v965_v15 = vmul.f32 0.7978846, %v900_v16  ;;  %v905_v1 = vmul.f32 %v840_v44, %v2570_v7 }
 0x17f   :  { %v1093_v20 = vadd.f32 1.0, %v1488_v23  ;;  %v969_v36 = vmul.f32 0.7978846, %v904_v58  ;;  %v643_v29 = vmul.f32 0.5, %v2542_v40  ;;  %v640_v60 = vmul.f32 0.5, %v2562_v19 }
 0x180   :  { %1215 = vst.msk [vmem:[%s2637_s3 + $0x188] sm:$0xff] %vm125_vm0, %v1150_v6  ;;  %v1154_v22 = vmul.f32 %v1089_v30, %v634_v0  ;;  %1495 = vtanh.f32 %v965_v15  ;;  %v970_v32 = vmul.f32 0.7978846, %v905_v1  ;;  %v644_v24 = vmul.f32 0.5, %v2566_v50 }
 0x181   :  { %v1158_v42 = vmul.f32 %v1093_v20, %v638_v49  ;;  %1497 = vtanh.f32 %v969_v36  ;;  %v645_v47 = vmul.f32 0.5, %v2570_v7 }
 0x182   :  { %v1490_v5 = vpop.eup %1489  ;;  %1219 = vst [vmem:[%s2637_s3 + $0x1a8] sm:$0xff] %v1154_v22  ;;  %1499 = vtanh.f32 %v970_v32 }
 0x183   :  { %1223 = vst [vmem:[%s2637_s3 + $0x1c8] sm:$0xff] %v1158_v42  ;;  %v1090_v12 = vadd.f32 1.0, %v1490_v5 }
 0x185   :  { %v1155_v43 = vmul.f32 %v1090_v12, %v635_v61  ;;  %v1492_v27 = vpop.eup %1491 }
 0x186   :  { %v1094_v2 = vadd.f32 1.0, %v1492_v27 }
 0x187   :  { %1220 = vst.msk [vmem:[%s2637_s3 + $0x1b0] sm:$0xff] %vm125_vm0, %v1155_v43  ;;  %v1494_v48 = vpop.eup %1493 }
 0x188   :  { %v1159_v35 = vmul.f32 %v1094_v2, %v639_v51  ;;  %v1098_v18 = vadd.f32 1.0, %v1494_v48 }
 0x18a   :  { %v1496_v25 = vpop.eup %1495  ;;  %1224 = vst [vmem:[%s2637_s3 + $0x1d0] sm:$0xff] %v1159_v35  ;;  %v1163_v8 = vmul.f32 %v1098_v18, %v643_v29 }
 0x18b   :  { %v1095_v52 = vadd.f32 1.0, %v1496_v25  ;;  %v1498_v39 = vpop.eup %1497 }
 0x18c   :  { %1228 = vst [vmem:[%s2637_s3 + $0x1f0] sm:$0x3] %v1163_v8  ;;  %v1500_v55 = vpop.eup %1499  ;;  %v1099_v40 = vadd.f32 1.0, %v1498_v39 }
 0x18d   :  { %v1160_v11 = vmul.f32 %v1095_v52, %v640_v60  ;;  %v1100_v57 = vadd.f32 1.0, %v1500_v55 }
 0x18e   :  { %v1164_v19 = vmul.f32 %v1099_v40, %v644_v24 }
 0x18f   :  { %1225 = vst.msk [vmem:[%s2637_s3 + $0x1d8] sm:$0xff] %vm125_vm0, %v1160_v11  ;;  %v1165_v54 = vmul.f32 %v1100_v57, %v645_v47 }
 0x190   :  { %1229 = vst [vmem:[%s2637_s3 + $0x1f8] sm:$0x3] %v1164_v19 }
 0x191   :  { %1231 = vst.msk [vmem:[%s2637_s3 + $0x200] sm:$0x3] %vm1230_vm2, %v1165_v54 }

</bundles_post_ra>
